<compile_context>
chip_gen: v5e
topology: v5e:2x2
jax: 0.10.0
libtpu: 0.0.40
codegen_flags: <defaults>
</compile_context>

<pallas_src>
import functools

import jax
import jax.numpy as jnp
import numpy as np
from jax import lax
from jax.experimental import pallas as pl
from jax.experimental.pallas import tpu as pltpu


def _fused_conv_stack_kernel(x_ref, w_ref, b_ref, m_ref, o_ref, act_ref, *,
                             num_layers, K, pad, Cin, Cout, Cmax, H, W, B):
    """B images: num_layers x (KxK 'same' conv + bias + ReLU), all in VMEM.

    x_ref  : (B, Cin, H*W)        lane-dense input block
    w_ref  : (L, Cout, K*K*Cmax)  stacked, channel-padded weights (bf16)
    b_ref  : (L, Cout, 1)         stacked biases (f32)
    m_ref  : (K*K, 1, B*H*W)      per-tap zero-padding masks (f32 0/1)
    o_ref  : (B, Cout, H*W)       lane-dense output block
    act_ref: (Cmax, B*H*W)        flat activation scratch (f32)
    """
    HW = H * W
    BHW = B * HW

    # Keep the zero-weight-padded channels of layer 0 free of NaN/Inf garbage.
    # Runs every grid step on purpose — do NOT gate on program_id: with
    # "parallel" semantics each v7x core starts at a different grid index.
    if Cin < Cmax:
        act_ref[...] = jnp.zeros_like(act_ref)
    for b in range(B):
        act_ref[0:Cin, b * HW:(b + 1) * HW] = x_ref[b].astype(act_ref.dtype)

    for l in range(num_layers):
        act = act_ref[...]                                   # (Cmax, BHW) f32

        # im2col via lane shifts: tap (kh, kw) of output p reads input p + d,
        # d = (kh-pad)*W + (kw-pad); out-of-image taps are zeroed by the mask
        # (this IS the zero padding).  Rolls use the XLU slot, the mask
        # multiply the VPU slot; neither touches the ld/st slots.
        slabs = []
        for kh in range(K):
            for kw in range(K):
                dh, dw = kh - pad, kw - pad
                if dh == 0 and dw == 0:
                    slabs.append(act)                        # mask is all-ones
                else:
                    d = dh * W + dw
                    shifted = pltpu.roll(act, shift=(-d) % BHW, axis=1)
                    slabs.append(shifted * m_ref[kh * K + kw])
        # 8-sublane slabs concatenate for free under the f32 (8,128) tiling.
        patches = jnp.concatenate(slabs, axis=0)             # (K*K*Cmax, BHW)

        # One MXU matmul per layer: bf16 operands, f32 accumulate.
        acc = jnp.dot(w_ref[l], patches.astype(w_ref.dtype),
                      preferred_element_type=jnp.float32)    # (Cout, BHW)
        acc = jnp.maximum(acc + b_ref[l], 0.0)               # bias + ReLU

        if l == num_layers - 1:
            for b in range(B):
                o_ref[b] = acc[:, b * HW:(b + 1) * HW].astype(o_ref.dtype)
        elif Cout == Cmax:
            act_ref[...] = acc                               # full unmasked store
        else:
            # Channels [Cout:Cmax] keep their old contents; the next layer's
            # weight columns there are zero, so they contribute nothing.
            act_ref[0:Cout, :] = acc


def conv_modules_forward(x_nchw, params, padding=1, stride=1, dilation=1,
                         groups=1):
    """ConvModules.forward: num_convs sequential (Conv2d + bias + ReLU) blocks.

    x_nchw : (N, C, H, W), PyTorch layout.
    params : list of (weight (Cout, Cin_l, K, K) OIHW, bias (Cout,)).
    """
    # TODO(synk): only the default ConvModules config (stride=1, dilation=1,
    # groups=1, 'same' padding, no norm/dropout) is implemented.
    assert stride == 1 and dilation == 1 and groups == 1

    N, Cin, H, W = x_nchw.shape
    L = len(params)
    Cout, _, KH, KW = params[0][0].shape
    assert KH == KW, "square kernels only"
    K = KH
    assert H + 2 * padding - K + 1 == H, "fused stack requires 'same' output"
    assert params[0][0].shape[1] == Cin
    for w, b in params[1:]:
        assert w.shape == (Cout, Cout, K, K)

    Cmax = max(Cin, Cout)
    KK = K * K
    KKC = KK * Cmax
    HW = H * W

    # ---- batch block B: widen the matmul RHS lane axis, keep >= 2 grid steps
    # (both v7x TensorCores busy), stay within ~1/4 of device VMEM per step.
    try:
        vmem_cap = int(pltpu.get_tpu_info().vmem_capacity_bytes)
    except Exception:  # not queryable -> assume v7x's 64 MiB (worst case)
        vmem_cap = 64 * 1024 * 1024
    per_image = (6 * KKC + Cmax + 2 * Cin + 3 * Cout + 2 * KK) * HW * 4
    b_cap = max(1, (vmem_cap // 4) // per_image)
    B = int(min(N, max(1, 2048 // HW), b_cap))
    while B > 1 and (N + B - 1) // B < 2:
        B -= 1
    while N % B:                       # exact blocks only
        B -= 1
    BHW = B * HW

    # ---- pack weights/biases: tap-major, channel-minor, channel-padded to
    # Cmax so one stacked bf16 tensor drives a uniform in-kernel layer loop.
    w_list, b_list = [], []
    for w, b in params:
        O, I = w.shape[0], w.shape[1]
        wt = jnp.transpose(w, (0, 2, 3, 1))                  # (O, KH, KW, I)
        wt = jnp.pad(wt, ((0, 0), (0, 0), (0, 0), (0, Cmax - I)))
        w_list.append(wt.reshape(O, KKC))
        b_list.append(b.reshape(O, 1))
    w_stack = jnp.stack(w_list).astype(jnp.bfloat16)         # (L, Cout, KKC)
    b_stack = jnp.stack(b_list).astype(jnp.float32)          # (L, Cout, 1)

    # ---- per-tap zero-padding masks over the (batched) flat spatial axis.
    hh = np.arange(H).reshape(H, 1)
    ww = np.arange(W).reshape(1, W)
    rows = []
    for kh in range(K):
        for kw in range(K):
            dh, dw = kh - padding, kw - padding
            m = ((hh + dh >= 0) & (hh + dh < H) &
                 (ww + dw >= 0) & (ww + dw < W))
            rows.append(np.tile(m.reshape(1, HW).astype(np.float32), (1, B)))
    mask = jnp.asarray(np.stack(rows))                       # (K*K, 1, BHW)

    x_flat = x_nchw.reshape(N, Cin, HW)                      # free reshape

    kernel = functools.partial(
        _fused_conv_stack_kernel,
        num_layers=L, K=K, pad=padding, Cin=Cin, Cout=Cout, Cmax=Cmax,
        H=H, W=W, B=B)

    # ---- itemized VMEM footprint (bytes), 2x margin.
    itemsize = x_nchw.dtype.itemsize
    est = (Cmax * BHW * 4                      # activation scratch
           + 2 * B * Cin * HW * itemsize       # double-buffered input blocks
           + 2 * B * Cout * HW * itemsize      # double-buffered output blocks
           + 2 * L * Cout * KKC * 2            # resident weights (bf16)
           + 2 * L * Cout * 4                  # resident bias
           + 2 * KK * BHW * 4                  # resident tap masks
           + 5 * KKC * BHW * 4                 # live slab/patch temporaries
           + 2 * Cout * BHW * 4)               # accumulator / ReLU temps
    vmem_limit = int(min(128 * 1024 * 1024, max(4 * 1024 * 1024, 2 * est)))

    cost = pl.CostEstimate(
        flops=2 * L * Cout * KKC * N * HW,
        transcendentals=0,
        bytes_accessed=int(N * Cin * HW * itemsize + N * Cout * HW * itemsize
                           + L * Cout * KKC * 2 + L * Cout * 4
                           + KK * BHW * 4))

    # TODO(synk): mark the three constant-index_map residents with
    # pipeline_mode=pl.Buffered(1) once single-buffered residents are plumbed
    # through the pallas_call TPU pipeline (saves their spare buffer).
    out_flat = pl.pallas_call(
        kernel,
        out_shape=jax.ShapeDtypeStruct((N, Cout, HW), x_nchw.dtype),
        grid=(N // B,),
        in_specs=[
            pl.BlockSpec((B, Cin, HW), lambda n: (n, 0, 0)),
            pl.BlockSpec((L, Cout, KKC), lambda n: (0, 0, 0)),   # resident
            pl.BlockSpec((L, Cout, 1), lambda n: (0, 0, 0)),     # resident
            pl.BlockSpec((KK, 1, BHW), lambda n: (0, 0, 0)),     # resident
        ],
        out_specs=pl.BlockSpec((B, Cout, HW), lambda n: (n, 0, 0)),
        scratch_shapes=[pltpu.VMEM((Cmax, BHW), jnp.float32)],
        compiler_params=pltpu.CompilerParams(
            dimension_semantics=("parallel",),
            vmem_limit_bytes=vmem_limit),
        cost_estimate=cost,
    )(x_flat, w_stack, b_stack, mask)

    return out_flat.reshape(N, Cout, H, W)


def _reference(x_nchw, params, padding=1):
    # Pure-JAX reference (f32 lax conv) for the correctness check.
    x = x_nchw
    for w, b in params:  # w in OIHW
        x = lax.conv_general_dilated(
            x, w, window_strides=(1, 1),
            padding=[(padding, padding), (padding, padding)],
            dimension_numbers=("NCHW", "OIHW", "NCHW"))
        x = jnp.maximum(x + b[None, :, None, None], 0.0)
    return x


if __name__ == "__main__":
    # ConvModules(in_channels=4, out_channels=8, kernel_size=3, padding=1,
    #             num_convs=2)  -> default: no norm, bias=True, ReLU.
    N, Cin, H, W = 2, 4, 16, 16
    Cout, K, num_convs, padding = 8, 3, 2, 1

    key = jax.random.PRNGKey(0)
    keys = jax.random.split(key, 1 + 2 * num_convs)
    x = jax.random.normal(keys[0], (N, Cin, H, W), dtype=jnp.float32)

    params = []
    c_in = Cin
    for i in range(num_convs):
        fan_in = c_in * K * K
        bound = 1.0 / np.sqrt(fan_in)  # PyTorch Conv2d default init range
        w = jax.random.uniform(keys[1 + 2 * i], (Cout, c_in, K, K),
                               minval=-bound, maxval=bound, dtype=jnp.float32)
        b = jax.random.uniform(keys[2 + 2 * i], (Cout,),
                               minval=-bound, maxval=bound, dtype=jnp.float32)
        params.append((w, b))
        c_in = Cout

    out = conv_modules_forward(x, params, padding=padding)
    out = jax.block_until_ready(out)

    ref = _reference(x, params, padding=padding)
    assert out.shape == (N, Cout, H, W), out.shape
    # bf16 matmul operands with f32 accumulation -> loosened tolerance.
    np.testing.assert_allclose(np.asarray(out), np.asarray(ref),
                               rtol=2e-2, atol=2e-2)
    print("KERNEL_OK")
</pallas_src>

<mosaic_0001>
module attributes {stable_mosaic.version = 11 : i64} {
  func.func @_fused_conv_stack_kernel(%arg0: i32, %arg1: memref<1x4x256xf32, #tpu.memory_space<vmem>>, %arg2: memref<2x8x72xbf16, #tpu.memory_space<vmem>>, %arg3: memref<2x8x1xf32, #tpu.memory_space<vmem>>, %arg4: memref<9x1x256xf32, #tpu.memory_space<vmem>>, %arg5: memref<1x8x256xf32, #tpu.memory_space<vmem>>, %arg6: memref<8x256xf32, #tpu.memory_space<vmem>>) attributes {dimension_semantics = [#tpu.dimension_semantics<parallel>], iteration_bounds = array<i64: 2>, scalar_prefetch = 0 : i64, scratch_operands = 1 : i64, tpu.core_type = #tpu.core_type<tc>, window_params = [{transform_indices = @transform_0, window_bounds = array<i64: 1, 4, 256>}, {pipeline_mode = #tpu.pipeline_mode<synchronous>, transform_indices = @transform_1, window_bounds = array<i64: 2, 8, 72>}, {pipeline_mode = #tpu.pipeline_mode<synchronous>, transform_indices = @transform_2, window_bounds = array<i64: 2, 8, 1>}, {pipeline_mode = #tpu.pipeline_mode<synchronous>, transform_indices = @transform_3, window_bounds = array<i64: 9, 1, 256>}, {transform_indices = @transform_4, window_bounds = array<i64: 1, 8, 256>}]} {
    %cst = arith.constant 0.000000e+00 : f32
    %0 = vector.broadcast %cst : f32 to vector<8x256xf32>
    %c0 = arith.constant 0 : index
    %c0_0 = arith.constant 0 : index
    %1 = vector.load %arg6[%c0, %c0_0] : memref<8x256xf32, #tpu.memory_space<vmem>>, vector<8x256xf32>
    tpu.vector_store %arg6[%c0, %c0_0], %0 {strides = array<i32>} : memref<8x256xf32, #tpu.memory_space<vmem>>, vector<8x256xf32>,
    %c0_1 = arith.constant 0 : index
    %c0_2 = arith.constant 0 : index
    %c0_3 = arith.constant 0 : index
    %2 = vector.load %arg1[%c0_1, %c0_2, %c0_3] : memref<1x4x256xf32, #tpu.memory_space<vmem>>, vector<1x4x256xf32>
    %3 = vector.shape_cast %2 : vector<1x4x256xf32> to vector<4x256xf32>
    %c0_4 = arith.constant 0 : index
    %c0_5 = arith.constant 0 : index
    %4 = vector.load %arg6[%c0_4, %c0_5] : memref<8x256xf32, #tpu.memory_space<vmem>>, vector<4x256xf32>
    tpu.vector_store %arg6[%c0_4, %c0_5], %3 {strides = array<i32>} : memref<8x256xf32, #tpu.memory_space<vmem>>, vector<4x256xf32>,
    %c0_6 = arith.constant 0 : index
    %c0_7 = arith.constant 0 : index
    %5 = vector.load %arg6[%c0_6, %c0_7] : memref<8x256xf32, #tpu.memory_space<vmem>>, vector<8x256xf32>
    %c17_i32 = arith.constant 17 : i32
    %6 = tpu.dynamic_rotate %5 by %c17_i32 dim 1 : vector<8x256xf32>, i32 -> vector<8x256xf32>
    %c0_8 = arith.constant 0 : index
    %c0_9 = arith.constant 0 : index
    %c0_10 = arith.constant 0 : index
    %7 = vector.load %arg4[%c0_8, %c0_9, %c0_10] : memref<9x1x256xf32, #tpu.memory_space<vmem>>, vector<1x1x256xf32>
    %8 = vector.shape_cast %7 : vector<1x1x256xf32> to vector<1x256xf32>
    %9 = vector.broadcast %8 : vector<1x256xf32> to vector<8x256xf32>
    %10 = arith.mulf %6, %9 : vector<8x256xf32>
    %c16_i32 = arith.constant 16 : i32
    %11 = tpu.dynamic_rotate %5 by %c16_i32 dim 1 : vector<8x256xf32>, i32 -> vector<8x256xf32>
    %c1 = arith.constant 1 : index
    %c0_11 = arith.constant 0 : index
    %c0_12 = arith.constant 0 : index
    %12 = vector.load %arg4[%c1, %c0_11, %c0_12] : memref<9x1x256xf32, #tpu.memory_space<vmem>>, vector<1x1x256xf32>
    %13 = vector.shape_cast %12 : vector<1x1x256xf32> to vector<1x256xf32>
    %14 = vector.broadcast %13 : vector<1x256xf32> to vector<8x256xf32>
    %15 = arith.mulf %11, %14 : vector<8x256xf32>
    %c15_i32 = arith.constant 15 : i32
    %16 = tpu.dynamic_rotate %5 by %c15_i32 dim 1 : vector<8x256xf32>, i32 -> vector<8x256xf32>
    %c2 = arith.constant 2 : index
    %c0_13 = arith.constant 0 : index
    %c0_14 = arith.constant 0 : index
    %17 = vector.load %arg4[%c2, %c0_13, %c0_14] : memref<9x1x256xf32, #tpu.memory_space<vmem>>, vector<1x1x256xf32>
    %18 = vector.shape_cast %17 : vector<1x1x256xf32> to vector<1x256xf32>
    %19 = vector.broadcast %18 : vector<1x256xf32> to vector<8x256xf32>
    %20 = arith.mulf %16, %19 : vector<8x256xf32>
    %c1_i32 = arith.constant 1 : i32
    %21 = tpu.dynamic_rotate %5 by %c1_i32 dim 1 : vector<8x256xf32>, i32 -> vector<8x256xf32>
    %c3 = arith.constant 3 : index
    %c0_15 = arith.constant 0 : index
    %c0_16 = arith.constant 0 : index
    %22 = vector.load %arg4[%c3, %c0_15, %c0_16] : memref<9x1x256xf32, #tpu.memory_space<vmem>>, vector<1x1x256xf32>
    %23 = vector.shape_cast %22 : vector<1x1x256xf32> to vector<1x256xf32>
    %24 = vector.broadcast %23 : vector<1x256xf32> to vector<8x256xf32>
    %25 = arith.mulf %21, %24 : vector<8x256xf32>
    %c255_i32 = arith.constant 255 : i32
    %26 = tpu.dynamic_rotate %5 by %c255_i32 dim 1 : vector<8x256xf32>, i32 -> vector<8x256xf32>
    %c5 = arith.constant 5 : index
    %c0_17 = arith.constant 0 : index
    %c0_18 = arith.constant 0 : index
    %27 = vector.load %arg4[%c5, %c0_17, %c0_18] : memref<9x1x256xf32, #tpu.memory_space<vmem>>, vector<1x1x256xf32>
    %28 = vector.shape_cast %27 : vector<1x1x256xf32> to vector<1x256xf32>
    %29 = vector.broadcast %28 : vector<1x256xf32> to vector<8x256xf32>
    %30 = arith.mulf %26, %29 : vector<8x256xf32>
    %c241_i32 = arith.constant 241 : i32
    %31 = tpu.dynamic_rotate %5 by %c241_i32 dim 1 : vector<8x256xf32>, i32 -> vector<8x256xf32>
    %c6 = arith.constant 6 : index
    %c0_19 = arith.constant 0 : index
    %c0_20 = arith.constant 0 : index
    %32 = vector.load %arg4[%c6, %c0_19, %c0_20] : memref<9x1x256xf32, #tpu.memory_space<vmem>>, vector<1x1x256xf32>
    %33 = vector.shape_cast %32 : vector<1x1x256xf32> to vector<1x256xf32>
    %34 = vector.broadcast %33 : vector<1x256xf32> to vector<8x256xf32>
    %35 = arith.mulf %31, %34 : vector<8x256xf32>
    %c240_i32 = arith.constant 240 : i32
    %36 = tpu.dynamic_rotate %5 by %c240_i32 dim 1 : vector<8x256xf32>, i32 -> vector<8x256xf32>
    %c7 = arith.constant 7 : index
    %c0_21 = arith.constant 0 : index
    %c0_22 = arith.constant 0 : index
    %37 = vector.load %arg4[%c7, %c0_21, %c0_22] : memref<9x1x256xf32, #tpu.memory_space<vmem>>, vector<1x1x256xf32>
    %38 = vector.shape_cast %37 : vector<1x1x256xf32> to vector<1x256xf32>
    %39 = vector.broadcast %38 : vector<1x256xf32> to vector<8x256xf32>
    %40 = arith.mulf %36, %39 : vector<8x256xf32>
    %c239_i32 = arith.constant 239 : i32
    %41 = tpu.dynamic_rotate %5 by %c239_i32 dim 1 : vector<8x256xf32>, i32 -> vector<8x256xf32>
    %c8 = arith.constant 8 : index
    %c0_23 = arith.constant 0 : index
    %c0_24 = arith.constant 0 : index
    %42 = vector.load %arg4[%c8, %c0_23, %c0_24] : memref<9x1x256xf32, #tpu.memory_space<vmem>>, vector<1x1x256xf32>
    %43 = vector.shape_cast %42 : vector<1x1x256xf32> to vector<1x256xf32>
    %44 = vector.broadcast %43 : vector<1x256xf32> to vector<8x256xf32>
    %45 = arith.mulf %41, %44 : vector<8x256xf32>
    %46 = tpu.concatenate %10, %15, %20, %25, %5, %30, %35, %40, %45 in 0 : vector<8x256xf32>, vector<8x256xf32>, vector<8x256xf32>, vector<8x256xf32>, vector<8x256xf32>, vector<8x256xf32>, vector<8x256xf32>, vector<8x256xf32>, vector<8x256xf32> -> vector<72x256xf32>
    %c0_25 = arith.constant 0 : index
    %c0_26 = arith.constant 0 : index
    %c0_27 = arith.constant 0 : index
    %47 = vector.load %arg2[%c0_25, %c0_26, %c0_27] : memref<2x8x72xbf16, #tpu.memory_space<vmem>>, vector<1x8x72xbf16>
    %48 = vector.shape_cast %47 : vector<1x8x72xbf16> to vector<8x72xbf16>
    %49 = arith.truncf %46 : vector<72x256xf32> to vector<72x256xbf16>
    %cst_28 = arith.constant dense<0.000000e+00> : vector<8x256xf32>
    %50 = tpu.matmul %48, %49, %cst_28 {dimension_numbers = #tpu.dot_dimension_numbers<[1], [0], [0], [1], [0, 0, 1, 1], [], []>} : vector<8x72xbf16>, vector<72x256xbf16>, vector<8x256xf32> -> vector<8x256xf32>
    %c0_29 = arith.constant 0 : index
    %c0_30 = arith.constant 0 : index
    %c0_31 = arith.constant 0 : index
    %51 = vector.load %arg3[%c0_29, %c0_30, %c0_31] : memref<2x8x1xf32, #tpu.memory_space<vmem>>, vector<1x8x1xf32>
    %52 = vector.shape_cast %51 : vector<1x8x1xf32> to vector<8x1xf32>
    %53 = vector.broadcast %52 : vector<8x1xf32> to vector<8x256xf32>
    %54 = arith.addf %50, %53 : vector<8x256xf32>
    %cst_32 = arith.constant 0.000000e+00 : f32
    %55 = vector.broadcast %cst_32 : f32 to vector<8x256xf32>
    %56 = arith.maximumf %54, %55 : vector<8x256xf32>
    %c0_33 = arith.constant 0 : index
    %c0_34 = arith.constant 0 : index
    %57 = vector.load %arg6[%c0_33, %c0_34] : memref<8x256xf32, #tpu.memory_space<vmem>>, vector<8x256xf32>
    tpu.vector_store %arg6[%c0_33, %c0_34], %56 {strides = array<i32>} : memref<8x256xf32, #tpu.memory_space<vmem>>, vector<8x256xf32>,
    %c0_35 = arith.constant 0 : index
    %c0_36 = arith.constant 0 : index
    %58 = vector.load %arg6[%c0_35, %c0_36] : memref<8x256xf32, #tpu.memory_space<vmem>>, vector<8x256xf32>
    %c17_i32_37 = arith.constant 17 : i32
    %59 = tpu.dynamic_rotate %58 by %c17_i32_37 dim 1 : vector<8x256xf32>, i32 -> vector<8x256xf32>
    %c0_38 = arith.constant 0 : index
    %c0_39 = arith.constant 0 : index
    %c0_40 = arith.constant 0 : index
    %60 = vector.load %arg4[%c0_38, %c0_39, %c0_40] : memref<9x1x256xf32, #tpu.memory_space<vmem>>, vector<1x1x256xf32>
    %61 = vector.shape_cast %60 : vector<1x1x256xf32> to vector<1x256xf32>
    %62 = vector.broadcast %61 : vector<1x256xf32> to vector<8x256xf32>
    %63 = arith.mulf %59, %62 : vector<8x256xf32>
    %c16_i32_41 = arith.constant 16 : i32
    %64 = tpu.dynamic_rotate %58 by %c16_i32_41 dim 1 : vector<8x256xf32>, i32 -> vector<8x256xf32>
    %c1_42 = arith.constant 1 : index
    %c0_43 = arith.constant 0 : index
    %c0_44 = arith.constant 0 : index
    %65 = vector.load %arg4[%c1_42, %c0_43, %c0_44] : memref<9x1x256xf32, #tpu.memory_space<vmem>>, vector<1x1x256xf32>
    %66 = vector.shape_cast %65 : vector<1x1x256xf32> to vector<1x256xf32>
    %67 = vector.broadcast %66 : vector<1x256xf32> to vector<8x256xf32>
    %68 = arith.mulf %64, %67 : vector<8x256xf32>
    %c15_i32_45 = arith.constant 15 : i32
    %69 = tpu.dynamic_rotate %58 by %c15_i32_45 dim 1 : vector<8x256xf32>, i32 -> vector<8x256xf32>
    %c2_46 = arith.constant 2 : index
    %c0_47 = arith.constant 0 : index
    %c0_48 = arith.constant 0 : index
    %70 = vector.load %arg4[%c2_46, %c0_47, %c0_48] : memref<9x1x256xf32, #tpu.memory_space<vmem>>, vector<1x1x256xf32>
    %71 = vector.shape_cast %70 : vector<1x1x256xf32> to vector<1x256xf32>
    %72 = vector.broadcast %71 : vector<1x256xf32> to vector<8x256xf32>
    %73 = arith.mulf %69, %72 : vector<8x256xf32>
    %c1_i32_49 = arith.constant 1 : i32
    %74 = tpu.dynamic_rotate %58 by %c1_i32_49 dim 1 : vector<8x256xf32>, i32 -> vector<8x256xf32>
    %c3_50 = arith.constant 3 : index
    %c0_51 = arith.constant 0 : index
    %c0_52 = arith.constant 0 : index
    %75 = vector.load %arg4[%c3_50, %c0_51, %c0_52] : memref<9x1x256xf32, #tpu.memory_space<vmem>>, vector<1x1x256xf32>
    %76 = vector.shape_cast %75 : vector<1x1x256xf32> to vector<1x256xf32>
    %77 = vector.broadcast %76 : vector<1x256xf32> to vector<8x256xf32>
    %78 = arith.mulf %74, %77 : vector<8x256xf32>
    %c255_i32_53 = arith.constant 255 : i32
    %79 = tpu.dynamic_rotate %58 by %c255_i32_53 dim 1 : vector<8x256xf32>, i32 -> vector<8x256xf32>
    %c5_54 = arith.constant 5 : index
    %c0_55 = arith.constant 0 : index
    %c0_56 = arith.constant 0 : index
    %80 = vector.load %arg4[%c5_54, %c0_55, %c0_56] : memref<9x1x256xf32, #tpu.memory_space<vmem>>, vector<1x1x256xf32>
    %81 = vector.shape_cast %80 : vector<1x1x256xf32> to vector<1x256xf32>
    %82 = vector.broadcast %81 : vector<1x256xf32> to vector<8x256xf32>
    %83 = arith.mulf %79, %82 : vector<8x256xf32>
    %c241_i32_57 = arith.constant 241 : i32
    %84 = tpu.dynamic_rotate %58 by %c241_i32_57 dim 1 : vector<8x256xf32>, i32 -> vector<8x256xf32>
    %c6_58 = arith.constant 6 : index
    %c0_59 = arith.constant 0 : index
    %c0_60 = arith.constant 0 : index
    %85 = vector.load %arg4[%c6_58, %c0_59, %c0_60] : memref<9x1x256xf32, #tpu.memory_space<vmem>>, vector<1x1x256xf32>
    %86 = vector.shape_cast %85 : vector<1x1x256xf32> to vector<1x256xf32>
    %87 = vector.broadcast %86 : vector<1x256xf32> to vector<8x256xf32>
    %88 = arith.mulf %84, %87 : vector<8x256xf32>
    %c240_i32_61 = arith.constant 240 : i32
    %89 = tpu.dynamic_rotate %58 by %c240_i32_61 dim 1 : vector<8x256xf32>, i32 -> vector<8x256xf32>
    %c7_62 = arith.constant 7 : index
    %c0_63 = arith.constant 0 : index
    %c0_64 = arith.constant 0 : index
    %90 = vector.load %arg4[%c7_62, %c0_63, %c0_64] : memref<9x1x256xf32, #tpu.memory_space<vmem>>, vector<1x1x256xf32>
    %91 = vector.shape_cast %90 : vector<1x1x256xf32> to vector<1x256xf32>
    %92 = vector.broadcast %91 : vector<1x256xf32> to vector<8x256xf32>
    %93 = arith.mulf %89, %92 : vector<8x256xf32>
    %c239_i32_65 = arith.constant 239 : i32
    %94 = tpu.dynamic_rotate %58 by %c239_i32_65 dim 1 : vector<8x256xf32>, i32 -> vector<8x256xf32>
    %c8_66 = arith.constant 8 : index
    %c0_67 = arith.constant 0 : index
    %c0_68 = arith.constant 0 : index
    %95 = vector.load %arg4[%c8_66, %c0_67, %c0_68] : memref<9x1x256xf32, #tpu.memory_space<vmem>>, vector<1x1x256xf32>
    %96 = vector.shape_cast %95 : vector<1x1x256xf32> to vector<1x256xf32>
    %97 = vector.broadcast %96 : vector<1x256xf32> to vector<8x256xf32>
    %98 = arith.mulf %94, %97 : vector<8x256xf32>
    %99 = tpu.concatenate %63, %68, %73, %78, %58, %83, %88, %93, %98 in 0 : vector<8x256xf32>, vector<8x256xf32>, vector<8x256xf32>, vector<8x256xf32>, vector<8x256xf32>, vector<8x256xf32>, vector<8x256xf32>, vector<8x256xf32>, vector<8x256xf32> -> vector<72x256xf32>
    %c1_69 = arith.constant 1 : index
    %c0_70 = arith.constant 0 : index
    %c0_71 = arith.constant 0 : index
    %100 = vector.load %arg2[%c1_69, %c0_70, %c0_71] : memref<2x8x72xbf16, #tpu.memory_space<vmem>>, vector<1x8x72xbf16>
    %101 = vector.shape_cast %100 : vector<1x8x72xbf16> to vector<8x72xbf16>
    %102 = arith.truncf %99 : vector<72x256xf32> to vector<72x256xbf16>
    %cst_72 = arith.constant dense<0.000000e+00> : vector<8x256xf32>
    %103 = tpu.matmul %101, %102, %cst_72 {dimension_numbers = #tpu.dot_dimension_numbers<[1], [0], [0], [1], [0, 0, 1, 1], [], []>} : vector<8x72xbf16>, vector<72x256xbf16>, vector<8x256xf32> -> vector<8x256xf32>
    %c1_73 = arith.constant 1 : index
    %c0_74 = arith.constant 0 : index
    %c0_75 = arith.constant 0 : index
    %104 = vector.load %arg3[%c1_73, %c0_74, %c0_75] : memref<2x8x1xf32, #tpu.memory_space<vmem>>, vector<1x8x1xf32>
    %105 = vector.shape_cast %104 : vector<1x8x1xf32> to vector<8x1xf32>
    %106 = vector.broadcast %105 : vector<8x1xf32> to vector<8x256xf32>
    %107 = arith.addf %103, %106 : vector<8x256xf32>
    %cst_76 = arith.constant 0.000000e+00 : f32
    %108 = vector.broadcast %cst_76 : f32 to vector<8x256xf32>
    %109 = arith.maximumf %107, %108 : vector<8x256xf32>
    %c0_77 = arith.constant 0 : index
    %c0_78 = arith.constant 0 : index
    %c0_79 = arith.constant 0 : index
    %110 = vector.load %arg5[%c0_77, %c0_78, %c0_79] : memref<1x8x256xf32, #tpu.memory_space<vmem>>, vector<1x8x256xf32>
    %111 = vector.shape_cast %110 : vector<1x8x256xf32> to vector<8x256xf32>
    %112 = vector.shape_cast %109 : vector<8x256xf32> to vector<1x8x256xf32>
    tpu.vector_store %arg5[%c0_77, %c0_78, %c0_79], %112 {strides = array<i32>} : memref<1x8x256xf32, #tpu.memory_space<vmem>>, vector<1x8x256xf32>,
    return
  }
  func.func @transform_0(%arg0: i32) -> (i32, i32, i32) {
    %c0_i32 = arith.constant 0 : i32
    %c0_i32_0 = arith.constant 0 : i32
    %c0_i32_1 = arith.constant 0 : i32
    return %arg0, %c0_i32, %c0_i32_0 : i32, i32, i32
  }
  func.func @transform_1(%arg0: i32) -> (i32, i32, i32) {
    %c0_i32 = arith.constant 0 : i32
    %c0_i32_0 = arith.constant 0 : i32
    %c0_i32_1 = arith.constant 0 : i32
    %c0_i32_2 = arith.constant 0 : i32
    return %c0_i32, %c0_i32_0, %c0_i32_1 : i32, i32, i32
  }
  func.func @transform_2(%arg0: i32) -> (i32, i32, i32) {
    %c0_i32 = arith.constant 0 : i32
    %c0_i32_0 = arith.constant 0 : i32
    %c0_i32_1 = arith.constant 0 : i32
    %c0_i32_2 = arith.constant 0 : i32
    return %c0_i32, %c0_i32_0, %c0_i32_1 : i32, i32, i32
  }
  func.func @transform_3(%arg0: i32) -> (i32, i32, i32) {
    %c0_i32 = arith.constant 0 : i32
    %c0_i32_0 = arith.constant 0 : i32
    %c0_i32_1 = arith.constant 0 : i32
    %c0_i32_2 = arith.constant 0 : i32
    return %c0_i32, %c0_i32_0, %c0_i32_1 : i32, i32, i32
  }
  func.func @transform_4(%arg0: i32) -> (i32, i32, i32) {
    %c0_i32 = arith.constant 0 : i32
    %c0_i32_0 = arith.constant 0 : i32
    %c0_i32_1 = arith.constant 0 : i32
    return %arg0, %c0_i32, %c0_i32_0 : i32, i32, i32
  }
}

</mosaic_0001>

<bundles_post_ra>
// kernel: tpu_custom_call.1
= control target key start
LH: loop header
LB: loop body
LE: loop exit
PB: predicated region body
PF: predicated region fallthrough
CT: control target
= control target key end

     0   :  { %9 = vsyncpa [#allocation4], 0  ;;  %s1332_s0 = inlined_call_operand.hbm [shape: f32[2,4,256], index: 0, kind: input, shape index: {}]   ;;  %s1333_s1 = inlined_call_operand.hbm [shape: bf16[2,8,72], index: 1, kind: input, shape index: {}]   ;;  %s1334_s2 = inlined_call_operand.vmem [shape: f32[2,8,1], index: 2, kind: input, shape index: {}]   ;;  %s1335_s3 = inlined_call_operand.vmem [shape: f32[9,1,256], index: 3, kind: input, shape index: {}]   ;;  %s1336_s4 = inlined_call_operand.hbm [shape: f32[2,8,256], index: 4, kind: output, shape index: {}]  }
   0x1   :  { %11 = vsyncpa [#allocation4 + $0x1], 0 }
   0x2   :  { %12 = vsyncpa [#allocation7], 0 }
   0x3   :  { %13 = vsyncpa [#allocation5], 0 }
   0x4   :  { %15 = vsyncpa [#allocation5 + $0x1], 0  ;;  %s981_s15 = smov 0   ;;  %s983_s16 = smov 0  }
   0x5   :  { %s985_s17 = smov 0   ;;  %s987_s18 = smov 0  }
   0x6 LB: > { %s152_s21 = sshll.u32 %s1333_s1, 4  ;;  %s1005_s22 = sadd.s32 4294967295, %s941_s18   ;;  %s941_s18 = sphi %s987_s18, %s1346_s18   ;;  %s937_s17 = sphi %s985_s17, %s1345_s17   ;;  %s933_s16 = sphi %s983_s16, %s1344_s16   ;;  %s929_s15 = sphi %s981_s15, %s1343_s15   ;;  %s153_s21 = int_to_ptr.hbm [resolvable:$true] %s152_s21 }
   0x7   : > { %p704_p0 = scmp.ge.s32.totalorder %s941_s18, 1  ;;  %p42_p1 = scmp.eq.s32.totalorder %s1005_s22, 0 }
   0x8   : > { %p141_p2 = scmp.lt.s32.totalorder %s941_s18, 3  ;;  %s943_s24 = smov [#allocation6]  }
   0x9   : > { %s154_s25 = sshll.u32 %s943_s24, 4  ;;  %s944_s26 = smov 64   ;;  %s155_s25 = int_to_ptr.vmem [resolvable:$true] %s154_s25 }
   0xa   : > { %p1010_p3 = pnand %p704_p0, %p141_p2  ;;  %s945_s27 = smov 4  }
   0xb   : > { %s703_s28 = sadd.s32 4294967294, %s941_s18   ;;  %s1021_s29 = sadd.s32 1, %s941_s18  }
   0xc   : > { %p748_p4 = pneg %p1010_p3  ;;  %s28_s30 = sadd.s32 1, %s937_s17 }
   0xd   : > { %s25_s5 = ssub.s32 %s941_s18, %s1021_s29  ;;  %p35_p7 = scmp.ne.s32.totalorder %s937_s17, %s933_s16 }
   0xe   : > { %p749_p6 = pnand %p748_p4, %p42_p1  ;;  %p26_p8 = scmp.eq.s32.totalorder %s25_s5, 0 }
   0xf   : > { %p36_p9 = scmp.eq.s32.totalorder %s941_s18, 0  ;;  %p41_p10 = scmp.ne.s32.totalorder %s933_s16, %s929_s15 }
  0x10   : > { %751 = dma.hbm_to_vmem [thread:$0]  (!%p749_p6), %s153_s21, 128, %s155_s25, [#allocation7], %s944_s26, %s944_s26, %s945_s27  }
  0x11   : > { %p128_p11 = scmp.eq.s32.totalorder %s1005_s22, 1  ;;  %p1037_p12 = por %p42_p1, %p41_p10 }
  0x12   : > { %s1033_s6 = scalar_select %p26_p8, %s937_s17, %s28_s30  }
  0x13   : > { %p1041_p13 = por %p128_p11, %p35_p7  ;;  %p134_p0 = scmp.eq.s32.totalorder %s703_s28, 1 }
  0x14   : > { %p37_p2 = por %p36_p9, %p35_p7  ;;  %s174_s9 = sand.u32 1, %s937_s17  }
  0x15   : > { %p1046_p4 = por %p134_p0, %p41_p10  ;;  %p761_p6 = scmp.lt.s32.totalorder %s941_s18, 2 }
  0x16   : > { %s707_s11 = sshll.u32 %s174_s9, 3  ;;  %s738_s12 = sshll.u32 %s941_s18, 3 }
  0x17   : > { %s183_s19 = scalar_lea.hbm %s1332_s0, %s738_s12  ;;  %s178_s21 = scalar_lea.vmem [#allocation3], %s707_s11 }
  0x18   : > { %s185_s20 = sshll.u32 %s183_s19, 4  ;;  %s187_s24 = sshll.u32 %s178_s21, 4  ;;  %s186_s20 = int_to_ptr.hbm [resolvable:$true] %s185_s20  ;;  %s188_s24 = int_to_ptr.vmem [resolvable:$true] %s187_s24 }
  0x19   : > { %p1055_p8 = pnand %p761_p6, %p37_p2  ;;  %s175_s26 = scalar_lea.sflag [#allocation4], %s174_s9 }
  0x1a   : > { %s841_s27 = sshra.s32 %s186_s20, 4  ;;  %s848_s11 = scalar_lea.hbm %s1332_s0, 16  ;;  %s842_s27 = int_to_ptr.hbm [resolvable:$true] %s841_s27 }
  0x1b   : > { %s843_s28 = scalar_lea.hbm %s842_s27, 8  ;;  %p845_p9 = pneg %p1055_p8 }
  0x1c   : > { %p844_p7 = scmp.ne.s32.totalorder %s842_s27, %s843_s28  ;;  %p849_p0 = scmp.lt.s32.totalorder %s842_s27, %s1332_s0 }
  0x1d   : > { %p850_p2 = scmp.lt.s32.totalorder %s848_s11, %s843_s28 }
  0x1e   : > { %p846_p10 = pnand %p845_p9, %p844_p7 }
  0x1f   : > { %p851_p6 = por %p850_p2, %p849_p0 }
  0x20   : > { %p847_p11 = pneg %p846_p10 }
  0x22   : > { %p852_p5 = pnand %p851_p6, %p847_p11 }
  0x24   : > { %855 = shalt.err (!%p852_p5)
}
  0x25   : > { %755 = dma.hbm_to_vmem [thread:$0]  (!%p1055_p8), %s186_s20, 128, %s188_s24, %s175_s26  }
  0x26   : > { %196 = sbr.rel (%p1010_p3) target bundleno = 654 (0x28e), region = 36  ;;  %s1072_s9 = sand.u32 (!%p1010_p3), 1, %s933_s16  }
  0x27   : > { %s711_s14 = sshll.u32 (!%p1010_p3), %s1072_s9, 3  ;;  %s199_s19 = scalar_lea.sflag (!%p1010_p3), [#allocation4], %s1072_s9 }
  0x28   : > { %s202_s21 = scalar_lea.vmem (!%p1010_p3), [#allocation3], %s711_s14 }
  0x2b   : > { %916 = dma.done.wait (%p1037_p12), %s199_s19, 128  }
  0x2c   : > { %918 = vsyncadd (%p1037_p12), %s199_s19, 4294967168 }
  0x2d   : > { %920 = dma.done.wait (%p42_p1), [#allocation7], 128  }
  0x2e   : > { %922 = vsyncadd (%p42_p1), [#allocation7], 4294967168  ;;  %v946_v0 = vmov 0.0   ;;  %v236_v1 = vld [vmem:[%s202_s21] sm:$0xff]  ;;  %s947_s23 = smov 113   ;;  %s948_s7 = smov 111   ;;  %v251_v7 = vlaneseq }
  0x2f   : > { %234 = vst [vmem:[#allocation2] sm:$0xff] %v946_v0  ;;  %s949_s20 = smov 112   ;;  %s950_s24 = smov 127   ;;  %v720_v12 = vld [vmem:[%s1335_s3 + $0x10] sm:$0x3]  ;;  %vm397_vm3 = vcmask 1043456  }
  0x30   : > { %235 = vst [vmem:[#allocation2 + $0x8] sm:$0xff] %v946_v0  ;;  %s951_s25 = smov 15   ;;  %s952_s26 = smov 1   ;;  %v1120_v10 = vand.u32 127, %v251_v7  ;;  %v719_v13 = vld [vmem:[%s1335_s3 + $0xe] sm:$0x3] }
  0x31   : > { %238 = vst [vmem:[#allocation1] ss:$2 sm:$0xff] %v236_v1  ;;  %s953_s27 = smov 17   ;;  %s954_s28 = smov 16   ;;  %v718_v14 = vld [vmem:[%s1335_s3 + $0xc] sm:$0x3] }
  0x32   : > { %vm348_vm0 = vcmp.lt.s32.totalorder %v1120_v10, 112  ;;  %vm332_vm1 = vcmp.lt.s32.totalorder %v1120_v10, 113  ;;  %vm364_vm2 = vcmp.lt.s32.totalorder %v1120_v10, 111  ;;  %v370_v15 = vperm.slane %v720_v12, 0  ;;  %v717_v31 = vld [vmem:[%s1335_s3 + $0xa] sm:$0x3] }
  0x33   : > { %v371_v16 = vperm.slane %v720_v12, 1  ;;  %v354_v17 = vperm.slane %v719_v13, 0  ;;  %v355_v18 = vperm.slane %v719_v13, 1  ;;  %v338_v19 = vperm.slane %v718_v14, 0  ;;  %v387_v49 = vld [vmem:[%s1334_s2] sm:$0xff]  ;;  %s891_s30 = scalar_lea.hbm %s1336_s4, 32 }
  0x34   : > { %v339_v20 = vperm.slane %v718_v14, 1  ;;  %vm316_vm4 = vcmp.lt.s32.totalorder %v1120_v10, 127  ;;  %v322_v41 = vperm.slane %v717_v31, 0  ;;  %v323_v42 = vperm.slane %v717_v31, 1  ;;  %v716_v52 = vld [vmem:[%s1335_s3 + $0x6] sm:$0x3] }
  0x35   : > { %v955_v53 = vmov 0   ;;  %v715_v54 = vld [vmem:[%s1335_s3 + $0x4] sm:$0x3]  ;;  %vm300_vm5 = vcmp.lt.s32.totalorder %v1120_v10, 1  ;;  %v306_v57 = vperm.slane %v716_v52, 0  ;;  %v307_v59 = vperm.slane %v716_v52, 1 }
  0x36   : > { %809 = vset.pattern.permute.xlu1 %v955_v53  ;;  %810 = vset.pattern.permute.xlu0 %v955_v53  ;;  %vm284_vm6 = vcmp.lt.s32.totalorder %v1120_v10, 15  ;;  %v290_v60 = vperm.slane %v715_v54, 0  ;;  %v291_v61 = vperm.slane %v715_v54, 1  ;;  %v256_v12 = vld [vmem:[%s1335_s3] sm:$0x3]  ;;  %vm253_vm7 = vcmp.lt.s32.totalorder %v1120_v10, 17 }
  0x37   : > { %v714_v13 = vld [vmem:[%s1335_s3 + $0x2] sm:$0x3]  ;;  %vm268_vm8 = vcmp.lt.s32.totalorder %v1120_v10, 16  ;;  %v376_v31 = vld [vmem:[#allocation6] sm:$0xf]  ;;  %vm393_vm9 = vcmask 588800  }
  0x38   : > { %v239_v2 = vld.sshfl [vmem:[#allocation1] sm:$0xff pattern:$0x75316420]  ;;  %v240_v3 = vld.sshfl [vmem:[#allocation1 + $0x8] sm:$0xff pattern:$0x75316420] }
  0x39   : > { %243 = vst [vmem:[#allocation2] sm:$0xf] %v239_v2  ;;  %v728_v54 = vld [vmem:[%s1335_s3 + $0xe] sm:$0x3] }
  0x3a   : > { %244 = vst [vmem:[#allocation2 + $0x8] sm:$0xf] %v240_v3 }
  0x40   : > { %v1084_v4 = vld [vmem:[#allocation2] sm:$0xff] }
  0x41   : > { %328 = vrot.lane.b32.xlu1 %v1084_v4, %s947_s23  ;;  %360 = vrot.lane.b32.xlu0 %v1084_v4, %s948_s7  ;;  %v1092_v5 = vld [vmem:[#allocation2 + $0x8] sm:$0xff] }
  0x42   : > { %344 = vrot.lane.b32.xlu2 %v1084_v4, %s949_s20 }
  0x49   : > { %330 = vrot.lane.b32.xlu1 %v1092_v5, %s947_s23  ;;  %362 = vrot.lane.b32.xlu0 %v1092_v5, %s948_s7 }
  0x4a   : > { %346 = vrot.lane.b32.xlu2 %v1092_v5, %s949_s20 }
  0x51   : > { %314 = vrot.lane.b32.xlu1 %v1092_v5, %s950_s24  ;;  %312 = vrot.lane.b32.xlu0 %v1084_v4, %s950_s24 }
  0x52   : > { %280 = vrot.lane.b32.xlu2 %v1084_v4, %s951_s25 }
  0x59   : > { %296 = vrot.lane.b32.xlu1 %v1084_v4, %s952_s26  ;;  %282 = vrot.lane.b32.xlu0 %v1092_v5, %s951_s25 }
  0x5a   : > { %298 = vrot.lane.b32.xlu2 %v1092_v5, %s952_s26 }
  0x61   : > { %249 = vrot.lane.b32.xlu1 %v1092_v5, %s953_s27  ;;  %247 = vrot.lane.b32.xlu0 %v1084_v4, %s953_s27 }
  0x62   : > { %264 = vrot.lane.b32.xlu2 %v1084_v4, %s954_s28 }
  0x69   : > { %266 = vrot.lane.b32.xlu0 %v1092_v5, %s954_s28  ;;  %390 = vperm.xlu1 %809, %v387_v49  }
  0x9c   : > { %v345_v6 = vpop.permute.xlu2 %344 }
  0xa4   : > { %v347_v11 = vpop.permute.xlu2 %346 }
  0xa5   : > { %v349_v23 = vsel %vm348_vm0, %v345_v6, %v347_v11  ;;  %v350_v27 = vsel %vm348_vm0, %v347_v11, %v345_v6 }
  0xa6   : > { %v358_v32 = vmul.f32 %v354_v17, %v349_v23  ;;  %v359_v37 = vmul.f32 %v355_v18, %v350_v27  ;;  %v274_v18 = vperm.slane %v714_v13, 0 }
  0xac   : > { %v281_v36 = vpop.permute.xlu2 %280 }
  0xb3   : > { %v329_v8 = vpop.permute.xlu1 %328  ;;  %v361_v9 = vpop.permute.xlu0 %360 }
  0xb4   : > { %v299_v58 = vpop.permute.xlu2 %298 }
  0xbb   : > { %v331_v21 = vpop.permute.xlu1 %330  ;;  %v363_v22 = vpop.permute.xlu0 %362 }
  0xbc   : > { %v333_v24 = vsel %vm332_vm1, %v329_v8, %v331_v21  ;;  %v365_v25 = vsel %vm364_vm2, %v361_v9, %v363_v22  ;;  %v366_v26 = vsel %vm364_vm2, %v363_v22, %v361_v9  ;;  %v334_v28 = vsel %vm332_vm1, %v331_v21, %v329_v8  ;;  %v265_v17 = vpop.permute.xlu2 %264 }
  0xbd   : > { %v374_v29 = vmul.f32 %v370_v15, %v365_v25  ;;  %v375_v30 = vmul.f32 %v371_v16, %v366_v26  ;;  %v342_v33 = vmul.f32 %v338_v19, %v333_v24  ;;  %v343_v38 = vmul.f32 %v339_v20, %v334_v28 }
  0xbe   : > { %v258_v15 = vperm.slane %v256_v12, 0  ;;  %v259_v16 = vperm.slane %v256_v12, 1  ;;  %v275_v19 = vperm.slane %v714_v13, 1  ;;  %v726_v12 = vld [vmem:[%s1335_s3 + $0xa] sm:$0x3] }
  0xbf   : > { %v385_v34 = vpack.c.bf16 %v374_v29, %v374_v29  ;;  %v386_v35 = vpack.c.bf16 %v375_v30, %v375_v30  ;;  %v383_v45 = vpack.c.bf16 %v358_v32, %v342_v33  ;;  %v384_v48 = vpack.c.bf16 %v359_v37, %v343_v38 }
  0xc1   : > { %v399_v39 = vsel %vm397_vm3, %v385_v34, 0  ;;  %v402_v40 = vsel %vm397_vm3, %v386_v35, 0 }
  0xc2   : > { %407 = vmatpush.bf16.msra.mxu0 %v399_v39  ;;  %420 = vmatpush.bf16.msra.mxu1 %v402_v40 }
  0xc3   : > { %v315_v43 = vpop.permute.xlu1 %314  ;;  %v313_v44 = vpop.permute.xlu0 %312 }
  0xc4   : > { %v317_v46 = vsel %vm316_vm4, %v313_v44, %v315_v43  ;;  %v318_v47 = vsel %vm316_vm4, %v315_v43, %v313_v44  ;;  %v729_v43 = vld [vmem:[%s1335_s3 + $0x10] sm:$0x3] }
  0xc5   : > { %v326_v50 = vmul.f32 %v322_v41, %v317_v46  ;;  %v327_v51 = vmul.f32 %v323_v42, %v318_v47  ;;  %v542_v44 = vperm.slane %v729_v43, 0 }
  0xc6   : > { %408 = vmatpush.bf16.msra.mxu0 %v383_v45  ;;  %421 = vmatpush.bf16.msra.mxu1 %v384_v48  ;;  %v543_v45 = vperm.slane %v729_v43, 1  ;;  %v442_v43 = vld [vmem:[%s1335_s3] sm:$0x3] }
  0xc7   : > { %v381_v55 = vpack.c.bf16 %v326_v50, %v1084_v4  ;;  %v382_v56 = vpack.c.bf16 %v327_v51, %v1092_v5  ;;  %v727_v51 = vld [vmem:[%s1335_s3 + $0xc] sm:$0x3] }
  0xca   : > { %409 = vmatpush.bf16.msra.mxu0 %v381_v55  ;;  %422 = vmatpush.bf16.msra.mxu1 %v382_v56 }
  0xcb   : > { %v297_v62 = vpop.permute.xlu1 %296  ;;  %v283_v63 = vpop.permute.xlu0 %282 }
  0xcc   : > { %v301_v0 = vsel %vm300_vm5, %v297_v62, %v299_v58  ;;  %v302_v1 = vsel %vm300_vm5, %v299_v58, %v297_v62  ;;  %v285_v2 = vsel %vm284_vm6, %v281_v36, %v283_v63  ;;  %v286_v3 = vsel %vm284_vm6, %v283_v63, %v281_v36 }
  0xcd   : > { %v310_v4 = vmul.f32 %v306_v57, %v302_v1  ;;  %v311_v5 = vmul.f32 %v307_v59, %v301_v0  ;;  %v294_v6 = vmul.f32 %v290_v60, %v286_v3  ;;  %v295_v7 = vmul.f32 %v291_v61, %v285_v2 }
  0xce   : > { %v514_v57 = vperm.slane %v727_v51, 0  ;;  %v515_v58 = vperm.slane %v727_v51, 1  ;;  %v528_v61 = vperm.slane %v728_v54, 0  ;;  %v529_v62 = vperm.slane %v728_v54, 1 }
  0xcf   : > { %v379_v8 = vpack.c.bf16 %v310_v4, %v294_v6  ;;  %v380_v9 = vpack.c.bf16 %v311_v5, %v295_v7  ;;  %v730_v5 = vld [vmem:[%s1334_s2 + $0x8] sm:$0xff] }
  0xd1   : > { %410 = vmatpush.bf16.msra.mxu0 %v379_v8  ;;  %423 = vmatpush.bf16.msra.mxu1 %v380_v9 }
  0xd3   : > { %v248_v11 = vpop.permute.xlu0 %247  ;;  %v250_v14 = vpop.permute.xlu1 %249 }
  0xd4   : > { %v254_v20 = vsel %vm253_vm7, %v248_v11, %v250_v14  ;;  %v255_v21 = vsel %vm253_vm7, %v250_v14, %v248_v11 }
  0xd5   : > { %v262_v25 = vmul.f32 %v258_v15, %v255_v21  ;;  %v263_v26 = vmul.f32 %v259_v16, %v254_v20  ;;  %v500_v15 = vperm.slane %v726_v12, 0  ;;  %v501_v16 = vperm.slane %v726_v12, 1 }
  0xdb   : > { %v267_v22 = vpop.permute.xlu0 %266  ;;  %v391_v32 = vpop.permute.xlu1 %390 }
  0xdc   : > { %v269_v23 = vsel %vm268_vm8, %v265_v17, %v267_v22  ;;  %v270_v24 = vsel %vm268_vm8, %v267_v22, %v265_v17 }
  0xdd   : > { %v278_v27 = vmul.f32 %v274_v18, %v270_v24  ;;  %v279_v28 = vmul.f32 %v275_v19, %v269_v23  ;;  %v724_v23 = vld [vmem:[%s1335_s3 + $0x4] sm:$0x3]  ;;  %v725_v24 = vld [vmem:[%s1335_s3 + $0x6] sm:$0x3] }
  0xdf   : > { %v377_v29 = vpack.c.bf16 %v278_v27, %v262_v25  ;;  %v378_v30 = vpack.c.bf16 %v279_v28, %v263_v26  ;;  %v472_v28 = vperm.slane %v724_v23, 0 }
  0xe1   : > { %411 = vmatpush.bf16.msra.mxu0 %v377_v29  ;;  %424 = vmatpush.bf16.msra.mxu1 %v378_v30  ;;  %v473_v29 = vperm.slane %v724_v23, 1  ;;  %v486_v30 = vperm.slane %v725_v24, 0 }
  0xe4   : > { %721 = vmatmul.msk.bf16.vlgmr.msra.gmra.mxu0 %vm393_vm9, %v376_v31  ;;  %722 = vmatmul.msk.bf16.vlgmr.msra.gmra.mxu1 %vm393_vm9, %v376_v31  ;;  %v487_v31 = vperm.slane %v725_v24, 1 }
 0x161   : > { %v413_v33 = vpop.f32.mrf.mxu0  ;;  %v426_v34 = vpop.f32.mrf.mxu1 }
 0x162   : > { %v414_v35 = vadd.f32 %v413_v33, %v391_v32  ;;  %v427_v36 = vadd.f32 %v426_v34, %v391_v32 }
 0x164   : > { %v1195_v37 = vmax.f32 %v414_v35, 0.0  ;;  %v1197_v38 = vmax.f32 %v427_v36, 0.0 }
 0x166   : > { %432 = vst [vmem:[#allocation2] sm:$0xff] %v1195_v37  ;;  %506 = vrot.lane.b32.xlu1 %v1195_v37, %s947_s23  ;;  %534 = vrot.lane.b32.xlu2 %v1195_v37, %s948_s7 }
 0x167   : > { %433 = vst [vmem:[#allocation2 + $0x8] sm:$0xff] %v1197_v38  ;;  %536 = vrot.lane.b32.xlu0 %v1197_v38, %s948_s7 }
 0x169   : > { %v415_v39 = vpop.f32.mrf.mxu0  ;;  %v428_v40 = vpop.f32.mrf.mxu1 }
 0x16e   : > { %522 = vrot.lane.b32.xlu1 %v1197_v38, %s949_s20  ;;  %508 = vrot.lane.b32.xlu2 %v1197_v38, %s947_s23 }
 0x16f   : > { %520 = vrot.lane.b32.xlu0 %v1195_v37, %s949_s20  ;;  %s713_s20 = sshll.u32 %s1072_s9, 4 }
 0x176   : > { %464 = vrot.lane.b32.xlu1 %v1195_v37, %s951_s25  ;;  %492 = vrot.lane.b32.xlu2 %v1195_v37, %s950_s24 }
 0x177   : > { %494 = vrot.lane.b32.xlu0 %v1197_v38, %s950_s24  ;;  %s739_s24 = sshll.u32 %s1005_s22, 4  ;;  %s607_s22 = scalar_lea.sflag [#allocation5], %s1072_s9 }
 0x17e   : > { %480 = vrot.lane.b32.xlu1 %v1197_v38, %s952_s26  ;;  %466 = vrot.lane.b32.xlu2 %v1197_v38, %s951_s25 }
 0x17f   : > { %478 = vrot.lane.b32.xlu0 %v1195_v37, %s952_s26 }
 0x186   : > { %450 = vrot.lane.b32.xlu1 %v1195_v37, %s954_s28  ;;  %436 = vrot.lane.b32.xlu2 %v1195_v37, %s953_s27 }
 0x187   : > { %438 = vrot.lane.b32.xlu0 %v1197_v38, %s953_s27  ;;  %s618_s27 = scalar_lea.hbm %s1336_s4, %s739_s24 }
 0x188   : > { %s622_s12 = sshll.u32 %s618_s27, 4  ;;  %s623_s12 = int_to_ptr.hbm [resolvable:$true] %s622_s12 }
 0x189   : > { %s885_s13 = sshra.s32 %s623_s12, 4  ;;  %s886_s13 = int_to_ptr.hbm [resolvable:$true] %s885_s13 }
 0x18a   : > { %s887_s14 = scalar_lea.hbm %s886_s13, 16  ;;  %p892_p12 = scmp.lt.s32.totalorder %s886_s13, %s1336_s4 }
 0x18b   : > { %p888_p1 = scmp.ne.s32.totalorder %s886_s13, %s887_s14  ;;  %p893_p8 = scmp.lt.s32.totalorder %s891_s30, %s887_s14 }
 0x18d   : > { %p889_p3 = pnand %p888_p1, %p1041_p13  ;;  %p894_p7 = por %p893_p8, %p892_p12 }
 0x18e   : > { %452 = vrot.lane.b32.xlu2 %v1197_v38, %s954_s28  ;;  %s232_s28 = scalar_lea.vmem [#allocation8], %s713_s20 }
 0x18f   : > { %564 = vperm.xlu0 %810, %v730_v5   ;;  %s620_s11 = sshll.u32 %s232_s28, 4  ;;  %p890_p5 = pneg %p889_p3  ;;  %s621_s11 = int_to_ptr.vmem [resolvable:$true] %s620_s11 }
 0x191   : > { %p895_p9 = pnand %p894_p7, %p890_p5 }
 0x1c0   : > { %v535_v41 = vpop.permute.xlu2 %534 }
 0x1c8   : > { %v509_v42 = vpop.permute.xlu2 %508 }
 0x1d0   : > { %v493_v48 = vpop.permute.xlu2 %492 }
 0x1d8   : > { %v507_v46 = vpop.permute.xlu1 %506  ;;  %v467_v11 = vpop.permute.xlu2 %466 }
 0x1d9   : > { %v537_v47 = vpop.permute.xlu0 %536  ;;  %v510_v63 = vsel %vm332_vm1, %v507_v46, %v509_v42  ;;  %v511_v0 = vsel %vm332_vm1, %v509_v42, %v507_v46  ;;  %v723_v42 = vld [vmem:[%s1335_s3 + $0x2] sm:$0x3] }
 0x1da   : > { %v538_v49 = vsel %vm364_vm2, %v535_v41, %v537_v47  ;;  %v539_v50 = vsel %vm364_vm2, %v537_v47, %v535_v41  ;;  %v518_v6 = vmul.f32 %v514_v57, %v510_v63  ;;  %v519_v7 = vmul.f32 %v515_v58, %v511_v0  ;;  %v549_v63 = vld [vmem:[#allocation6 + $0x4] sm:$0xf] }
 0x1db   : > { %v546_v52 = vmul.f32 %v542_v44, %v538_v49  ;;  %v547_v53 = vmul.f32 %v543_v45, %v539_v50  ;;  %v458_v46 = vperm.slane %v723_v42, 0  ;;  %v459_v47 = vperm.slane %v723_v42, 1 }
 0x1dc   : > { %v445_v49 = vperm.slane %v442_v43, 1 }
 0x1dd   : > { %v558_v55 = vpack.c.bf16 %v546_v52, %v546_v52  ;;  %v559_v56 = vpack.c.bf16 %v547_v53, %v547_v53 }
 0x1df   : > { %v571_v59 = vsel %vm397_vm3, %v558_v55, 0  ;;  %v574_v60 = vsel %vm397_vm3, %v559_v56, 0 }
 0x1e0   : > { %579 = vmatpush.bf16.msra.mxu2 %v571_v59  ;;  %592 = vmatpush.bf16.msra.mxu3 %v574_v60  ;;  %v523_v1 = vpop.permute.xlu1 %522  ;;  %v437_v27 = vpop.permute.xlu2 %436 }
 0x1e1   : > { %v521_v2 = vpop.permute.xlu0 %520 }
 0x1e2   : > { %v524_v3 = vsel %vm348_vm0, %v521_v2, %v523_v1  ;;  %v525_v4 = vsel %vm348_vm0, %v523_v1, %v521_v2 }
 0x1e3   : > { %v532_v8 = vmul.f32 %v528_v61, %v524_v3  ;;  %v533_v9 = vmul.f32 %v529_v62, %v525_v4 }
 0x1e5   : > { %v556_v13 = vpack.c.bf16 %v532_v8, %v518_v6  ;;  %v557_v14 = vpack.c.bf16 %v533_v9, %v519_v7 }
 0x1e7   : > { %580 = vmatpush.bf16.msra.mxu2 %v556_v13  ;;  %593 = vmatpush.bf16.msra.mxu3 %v557_v14 }
 0x1e8   : > { %v465_v17 = vpop.permute.xlu1 %464  ;;  %v453_v50 = vpop.permute.xlu2 %452 }
 0x1e9   : > { %v495_v18 = vpop.permute.xlu0 %494  ;;  %v468_v32 = vsel %vm284_vm6, %v465_v17, %v467_v11  ;;  %v469_v33 = vsel %vm284_vm6, %v467_v11, %v465_v17 }
 0x1ea   : > { %v496_v19 = vsel %vm316_vm4, %v493_v48, %v495_v18  ;;  %v497_v20 = vsel %vm316_vm4, %v495_v18, %v493_v48  ;;  %v477_v39 = vmul.f32 %v473_v29, %v468_v32  ;;  %v444_v48 = vperm.slane %v442_v43, 0 }
 0x1eb   : > { %v504_v21 = vmul.f32 %v500_v15, %v496_v19  ;;  %v505_v22 = vmul.f32 %v501_v16, %v497_v20 }
 0x1ed   : > { %v554_v25 = vpack.c.bf16 %v504_v21, %v1195_v37  ;;  %v555_v26 = vpack.c.bf16 %v505_v22, %v1197_v38  ;;  %v476_v38 = vmul.f32 %v472_v28, %v469_v33 }
 0x1ef   : > { %581 = vmatpush.bf16.msra.mxu2 %v554_v25  ;;  %594 = vmatpush.bf16.msra.mxu3 %v555_v26 }
 0x1f0   : > { %v481_v34 = vpop.permute.xlu1 %480 }
 0x1f1   : > { %v479_v35 = vpop.permute.xlu0 %478 }
 0x1f2   : > { %v482_v36 = vsel %vm300_vm5, %v479_v35, %v481_v34  ;;  %v483_v37 = vsel %vm300_vm5, %v481_v34, %v479_v35 }
 0x1f3   : > { %v490_v40 = vmul.f32 %v486_v30, %v483_v37  ;;  %v491_v41 = vmul.f32 %v487_v31, %v482_v36 }
 0x1f5   : > { %v552_v44 = vpack.c.bf16 %v490_v40, %v476_v38  ;;  %v553_v45 = vpack.c.bf16 %v491_v41, %v477_v39 }
 0x1f7   : > { %582 = vmatpush.bf16.msra.mxu2 %v552_v44  ;;  %595 = vmatpush.bf16.msra.mxu3 %v553_v45 }
 0x1f8   : > { %v451_v51 = vpop.permute.xlu1 %450 }
 0x1f9   : > { %v454_v52 = vsel %vm268_vm8, %v451_v51, %v453_v50  ;;  %v455_v53 = vsel %vm268_vm8, %v453_v50, %v451_v51  ;;  %v439_v54 = vpop.permute.xlu0 %438 }
 0x1fa   : > { %v462_v55 = vmul.f32 %v458_v46, %v455_v53  ;;  %v463_v56 = vmul.f32 %v459_v47, %v454_v52  ;;  %v440_v57 = vsel %vm253_vm7, %v437_v27, %v439_v54  ;;  %v441_v58 = vsel %vm253_vm7, %v439_v54, %v437_v27 }
 0x1fb   : > { %v448_v59 = vmul.f32 %v444_v48, %v441_v58  ;;  %v449_v60 = vmul.f32 %v445_v49, %v440_v57 }
 0x1fd   : > { %v550_v61 = vpack.c.bf16 %v462_v55, %v448_v59  ;;  %v551_v62 = vpack.c.bf16 %v463_v56, %v449_v60 }
 0x1ff   : > { %583 = vmatpush.bf16.msra.mxu2 %v550_v61  ;;  %596 = vmatpush.bf16.msra.mxu3 %v551_v62 }
 0x201   : > { %v565_v0 = vpop.permute.xlu0 %564 }
 0x202   : > { %731 = vmatmul.msk.bf16.vlgmr.msra.gmra.mxu2 %vm393_vm9, %v549_v63  ;;  %732 = vmatmul.msk.bf16.vlgmr.msra.gmra.mxu3 %vm393_vm9, %v549_v63 }
 0x285   : > { %v585_v10 = vpop.f32.mrf.mxu2  ;;  %v598_v1 = vpop.f32.mrf.mxu3 }
 0x286   : > { %v586_v2 = vadd.f32 %v585_v10, %v565_v0  ;;  %v599_v3 = vadd.f32 %v598_v1, %v565_v0 }
 0x288   : > { %v602_v4 = vmax.f32 %v586_v2, 0.0  ;;  %v603_v5 = vmax.f32 %v599_v3, 0.0 }
 0x28a   : > { %604 = vst [vmem:[%s232_s28] sm:$0xff] %v602_v4 }
 0x28b   : > { %605 = vst [vmem:[%s232_s28 + $0x8] sm:$0xff] %v603_v5 }
 0x28c   : > { %898 = shalt.err (!%p895_p9)
}
 0x28d   : > { %746 = dma.vmem_to_hbm [thread:$0]  (%p1041_p13), %s621_s11, 256, %s623_s12, %s607_s22   ;;  %v587_v6 = vpop.f32.mrf.mxu2  ;;  %v600_v7 = vpop.f32.mrf.mxu3 }
 0x28e PF: > { %s634_s9 = sand.u32 1, %s929_s15   ;;  %p1342_p10 = scmp.ge.s32.totalorder %s941_s18, 2 }
 0x28f   : > { %s635_s7 = scalar_lea.sflag [#allocation5], %s634_s9 }
 0x290   : > { %p757_p11 = pnand %p1342_p10, %p1046_p4 }
 0x292   : > { %p758_p0 = pneg %p757_p11 }
 0x294   : > { %924 = dma.done.wait (%p758_p0), %s635_s7, 256  }
 0x295   : > { %926 = vsyncadd (%p758_p0), %s635_s7, 4294967040  ;;  %p18_p13 = scmp.ge.s32.totalorder %s1021_s29, 4   ;;  %s1343_s15 = smov %s933_s16 }
 0x296   : > { %s1344_s16 = smov %s937_s17  ;;  %s1345_s17 = smov %s1033_s6 }
 0x297   : > { %s1346_s18 = smov %s1021_s29  ;;  %20 = sbr.rel (!%p18_p13) target bundleno = 6 (0x6), region = 94 }
 0x29c   :  { %641 = vsyncpa [#allocation4], 1 }
 0x29d   :  { %643 = vsyncpa [#allocation4 + $0x1], 1 }
 0x29e   :  { %644 = vsyncpa [#allocation7], 1 }
 0x29f   :  { %645 = vsyncpa [#allocation5], 1 }
 0x2a0   :  { %647 = vsyncpa [#allocation5 + $0x1], 1 }

</bundles_post_ra>
